<compile_context>
chip_gen: v5e
topology: v5e:2x2
jax: 0.10.0
libtpu: 0.0.40
codegen_flags: <defaults>
</compile_context>

<pallas_src>
import functools

import jax
import jax.numpy as jnp
from jax.experimental import pallas as pl
from jax.experimental.pallas import tpu as pltpu

_MIB = 1024 * 1024


def _rmsnorm_kernel(x_ref, w_ref, o_ref, *, eps: float, inv_dim: float):
    # Compute in float32 exactly like the torch module (x.float()).
    x = x_ref[...].astype(jnp.float32)                    # (tile_rows, dim)
    w = w_ref[...].astype(jnp.float32)                    # (1, dim)
    # sum * (1/dim) instead of mean(): avoids a lane-wide divide on the VPU;
    # rsqrt lands on the EUP slot (free in this mem-bound kernel).
    ms = jnp.sum(x * x, axis=-1, keepdims=True) * inv_dim  # (tile_rows, 1)
    inv = jax.lax.rsqrt(ms + eps)
    o_ref[...] = (x * inv * w).astype(o_ref.dtype)


def _vmem_capacity_bytes() -> int:
    """Physical VMEM per TensorCore; conservative fallback = 64 MiB (v7x)."""
    try:
        return int(pltpu.get_tpu_info().vmem_capacity_bytes)
    except Exception:
        return 64 * _MIB


def _sublane_multiple(dtype) -> int:
    return {4: 8, 2: 16, 1: 32}.get(jnp.dtype(dtype).itemsize, 8)


def _pick_row_tile(rows: int, dim: int, in_dtype, out_dtype,
                   vmem_budget: int, min_grid_steps: int = 8) -> int:
    sub = _sublane_multiple(in_dtype)
    rows_aligned = ((rows + sub - 1) // sub) * sub
    in_b = jnp.dtype(in_dtype).itemsize
    out_b = jnp.dtype(out_dtype).itemsize
    # Double-buffered input + output tile per grid step.
    per_row = dim * (in_b + out_b) * 2
    tile = max(sub, vmem_budget // per_row)
    # Keep at least a handful of grid steps so both v7x TensorCores stream
    # (near-neutral on single-TC v5e/v6e).
    tile = min(tile, max(sub, rows_aligned // min_grid_steps))
    tile = max(sub, (tile // sub) * sub)    # sublane-aligned, never below sub
    return min(tile, rows_aligned)


def rmsnorm(x: jax.Array, weight: jax.Array, eps: float = 1e-6) -> jax.Array:
    """RMSNorm over the last axis. x: [..., dim], weight: [dim]."""
    orig_shape = x.shape
    dim = orig_shape[-1]
    x2d = x.reshape(-1, dim)
    rows = x2d.shape[0]

    phys_vmem = _vmem_capacity_bytes()
    io_budget = phys_vmem // 2            # leave headroom: weight block, scratch
    vmem_limit = (phys_vmem * 3) // 4     # 48 MiB on v7x, 96 MiB on v5e/v6e

    tile = _pick_row_tile(rows, dim, x.dtype, x.dtype, io_budget)

    grid = pl.cdiv(rows, tile)
    rows_padded = grid * tile
    if rows_padded != rows:
        # Zero-padded rows are harmless: rsqrt(0 + eps) is finite and padded
        # outputs are sliced off below.
        x2d = jnp.pad(x2d, ((0, rows_padded - rows), (0, 0)))

    w2d = weight.reshape(1, dim)

    in_b = jnp.dtype(x.dtype).itemsize
    cost = pl.CostEstimate(
        flops=3 * rows * dim,
        transcendentals=rows,
        bytes_accessed=rows * dim * 2 * in_b
        + dim * jnp.dtype(weight.dtype).itemsize,
    )

    kernel = functools.partial(_rmsnorm_kernel, eps=float(eps),
                               inv_dim=1.0 / float(dim))

    out = pl.pallas_call(
        kernel,
        out_shape=jax.ShapeDtypeStruct((rows_padded, dim), x.dtype),
        grid_spec=pltpu.PrefetchScalarGridSpec(
            num_scalar_prefetch=0,
            grid=(grid,),
            in_specs=[
                pl.BlockSpec((tile, dim), lambda i: (i, 0)),
                pl.BlockSpec((1, dim), lambda i: (0, 0)),
            ],
            out_specs=pl.BlockSpec((tile, dim), lambda i: (i, 0)),
        ),
        compiler_params=pltpu.CompilerParams(
            dimension_semantics=("parallel",),
            vmem_limit_bytes=int(vmem_limit),
        ),
        cost_estimate=cost,
    )(x2d, w2d)

    if rows_padded != rows:
        out = out[:rows]
    return out.reshape(orig_shape)


def rmsnorm_ref(x, weight, eps=1e-6):
    dtype = x.dtype
    xf = x.astype(jnp.float32)
    y = xf * jax.lax.rsqrt(jnp.mean(xf * xf, axis=-1, keepdims=True) + eps) * weight
    return y.astype(dtype)


if __name__ == "__main__":
    key = jax.random.PRNGKey(0)

    # Main check: small shapes consistent with the module.
    batch, seq, hidden = 2, 8, 32
    kx, kw, kx2 = jax.random.split(key, 3)
    x = jax.random.normal(kx, (batch, seq, hidden), dtype=jnp.bfloat16)
    # nn.Parameter(torch.ones(dim)), perturbed so the weight actually matters.
    weight = jnp.ones((hidden,), dtype=jnp.float32) + 0.01 * jnp.arange(
        hidden, dtype=jnp.float32)

    out = rmsnorm(x, weight)
    jax.block_until_ready(out)
    ref = rmsnorm_ref(x, weight)
    assert out.shape == x.shape and out.dtype == x.dtype
    assert jnp.allclose(out.astype(jnp.float32), ref.astype(jnp.float32),
                        atol=1e-2, rtol=1e-2)

    # Second check: non-tile-divisible row count exercises the padding path
    # (rows = 15 -> padded to the sublane-aligned tile), f32 dtype, dim = 128.
    x2 = jax.random.normal(kx2, (3, 5, 128), dtype=jnp.float32)
    w2 = jnp.ones((128,), dtype=jnp.float32) + 0.005 * jnp.arange(
        128, dtype=jnp.float32)
    out2 = rmsnorm(x2, w2)
    jax.block_until_ready(out2)
    ref2 = rmsnorm_ref(x2, w2)
    assert out2.shape == x2.shape and out2.dtype == x2.dtype
    assert jnp.allclose(out2, ref2, atol=1e-5, rtol=1e-5)

    print("KERNEL_OK")
</pallas_src>

<mosaic_0001>
module attributes {stable_mosaic.version = 11 : i64} {
  func.func @_rmsnorm_kernel(%arg0: i32, %arg1: memref<16x32xbf16, #tpu.memory_space<vmem>>, %arg2: memref<1x32xf32, #tpu.memory_space<vmem>>, %arg3: memref<16x32xbf16, #tpu.memory_space<vmem>>) attributes {dimension_semantics = [#tpu.dimension_semantics<parallel>], iteration_bounds = array<i64: 1>, scalar_prefetch = 0 : i64, scratch_operands = 0 : i64, tpu.core_type = #tpu.core_type<tc>, window_params = [{transform_indices = @transform_0, window_bounds = array<i64: 16, 32>}, {pipeline_mode = #tpu.pipeline_mode<synchronous>, transform_indices = @transform_1, window_bounds = array<i64: 1, 32>}, {transform_indices = @transform_2, window_bounds = array<i64: 16, 32>}]} {
    %c0 = arith.constant 0 : index
    %c0_0 = arith.constant 0 : index
    %0 = vector.load %arg1[%c0, %c0_0] : memref<16x32xbf16, #tpu.memory_space<vmem>>, vector<16x32xbf16>
    %1 = arith.extf %0 : vector<16x32xbf16> to vector<16x32xf32>
    %c0_1 = arith.constant 0 : index
    %c0_2 = arith.constant 0 : index
    %2 = vector.load %arg2[%c0_1, %c0_2] : memref<1x32xf32, #tpu.memory_space<vmem>>, vector<1x32xf32>
    %3 = arith.mulf %1, %1 : vector<16x32xf32>
    %cst = arith.constant dense<0.000000e+00> : vector<16xf32>
    %4 = vector.multi_reduction <add>, %3, %cst [1] : vector<16x32xf32> to vector<16xf32>
    %5 = vector.shape_cast %4 : vector<16xf32> to vector<16x1xf32>
    %cst_3 = arith.constant 3.125000e-02 : f32
    %6 = vector.broadcast %cst_3 : f32 to vector<16x1xf32>
    %7 = arith.mulf %5, %6 : vector<16x1xf32>
    %cst_4 = arith.constant 9.99999997E-7 : f32
    %8 = vector.broadcast %cst_4 : f32 to vector<16x1xf32>
    %9 = arith.addf %7, %8 : vector<16x1xf32>
    %10 = math.rsqrt %9 : vector<16x1xf32>
    %11 = vector.broadcast %10 : vector<16x1xf32> to vector<16x32xf32>
    %12 = arith.mulf %1, %11 : vector<16x32xf32>
    %13 = vector.broadcast %2 : vector<1x32xf32> to vector<16x32xf32>
    %14 = arith.mulf %12, %13 : vector<16x32xf32>
    %15 = arith.truncf %14 : vector<16x32xf32> to vector<16x32xbf16>
    %c0_5 = arith.constant 0 : index
    %c0_6 = arith.constant 0 : index
    %16 = vector.load %arg3[%c0_5, %c0_6] : memref<16x32xbf16, #tpu.memory_space<vmem>>, vector<16x32xbf16>
    tpu.vector_store %arg3[%c0_5, %c0_6], %15 {strides = array<i32>} : memref<16x32xbf16, #tpu.memory_space<vmem>>, vector<16x32xbf16>,
    return
  }
  func.func @transform_0(%arg0: i32) -> (i32, i32) {
    %c0_i32 = arith.constant 0 : i32
    %c0_i32_0 = arith.constant 0 : i32
    return %arg0, %c0_i32 : i32, i32
  }
  func.func @transform_1(%arg0: i32) -> (i32, i32) {
    %c0_i32 = arith.constant 0 : i32
    %c0_i32_0 = arith.constant 0 : i32
    %c0_i32_1 = arith.constant 0 : i32
    return %c0_i32, %c0_i32_0 : i32, i32
  }
  func.func @transform_2(%arg0: i32) -> (i32, i32) {
    %c0_i32 = arith.constant 0 : i32
    %c0_i32_0 = arith.constant 0 : i32
    return %arg0, %c0_i32 : i32, i32
  }
}

</mosaic_0001>

<bundles_post_ra>
// kernel: tpu_custom_call.1
= control target key start
LH: loop header
LB: loop body
LE: loop exit
PB: predicated region body
PF: predicated region fallthrough
CT: control target
= control target key end

     0   :  { %7 = vsyncpa [#allocation3], 0  ;;  %s239_s0 = inlined_call_operand.hbm [shape: bf16[16,32], index: 0, kind: input, shape index: {}]   ;;  %s240_s1 = inlined_call_operand.hbm [shape: f32[1,32], index: 1, kind: input, shape index: {}]   ;;  %s241_s2 = inlined_call_operand.hbm [shape: bf16[16,32], index: 2, kind: output, shape index: {}]  }
   0x1   :  { %8 = vsyncpa [#allocation6], 0 }
   0x2   :  { %9 = vsyncpa [#allocation4], 0  ;;  %s14_s11 = sshll.u32 %s239_s0, 4  ;;  %s204_s12 = smov [#allocation2]   ;;  %s15_s11 = int_to_ptr.hbm [resolvable:$true] %s14_s11 }
   0x3   :  { %s16_s13 = sshll.u32 %s204_s12, 4  ;;  %s28_s16 = sshll.u32 %s240_s1, 4  ;;  %s17_s13 = int_to_ptr.vmem [resolvable:$true] %s16_s13  ;;  %s29_s16 = int_to_ptr.hbm [resolvable:$true] %s28_s16 }
   0x4   :  { %s205_s17 = smov 64   ;;  %s206_s18 = smov 4  }
   0x5   :  { %22 = dma.hbm_to_vmem [thread:$0]  %s15_s11, 128, %s17_s13, [#allocation3], %s205_s17, %s205_s17, %s206_s18  }
   0x6   :  { %s207_s19 = smov [#allocation5]  }
   0x7   :  { %s30_s20 = sshll.u32 %s207_s19, 4  ;;  %s31_s20 = int_to_ptr.vmem [resolvable:$true] %s30_s20 }
   0x8   :  { %33 = dma.hbm_to_vmem [thread:$0]  %s29_s16, 16, %s31_s20, [#allocation6]  }
   0x9   :  { %198 = dma.done.wait [#allocation3], 128  }
   0xa   :  { %199 = vsyncadd [#allocation3], 4294967168 }
   0xb   :  { %200 = dma.done.wait [#allocation6], 16  }
   0xc   :  { %201 = vsyncadd [#allocation6], 4294967280  ;;  %v113_v0 = vld [vmem:[#allocation2] sm:$0xff]   ;;  %vm49_vm0 = vcmask 261120   ;;  %v121_v21 = vld [vmem:[#allocation5] ss:$0 sm:$0xff] }
   0xd   :  { %v114_v1 = vunpack.c.l.bf16 %v113_v0  ;;  %v115_v3 = vunpack.c.h.bf16 %v113_v0  ;;  %vm89_vm5 = vcmask 257024   ;;  %s208_s0 = smov [#allocation7]   ;;  %s98_s23 = sshll.u32 %s241_s2, 4  ;;  %s99_s23 = int_to_ptr.hbm [resolvable:$true] %s98_s23 }
   0xe   :  { %s96_s1 = sshll.u32 %s208_s0, 4  ;;  %s97_s1 = int_to_ptr.vmem [resolvable:$true] %s96_s1 }
   0xf   :  { %v47_v2 = vmul.f32 %v114_v1, %v114_v1  ;;  %v48_v5 = vmul.f32 %v115_v3, %v115_v3 }
  0x11   :  { %v50_v4 = vsel %vm49_vm0, %v47_v2, 0.0  ;;  %v53_v6 = vsel %vm49_vm0, %v48_v5, 0.0 }
  0x12   :  { %51 = vadd.xlane.f32.xlu0 %v50_v4 }
  0x1a   :  { %54 = vadd.xlane.f32.xlu0 %v53_v6 }
  0x85   :  { %v52_v7 = vpop.xlane.xlu0 %51 }
  0x86   :  { %v56_v8 = vmul.f32 0.03125, %v52_v7 }
  0x88   :  { %v58_v9 = vadd.f32 1e-06, %v56_v8 }
  0x8a   :  { %122 = vrsqrt.f32 %v58_v9  ;;  %vm66_vm2 = vweird.f32 %v58_v9 }
  0x8d   :  { %v55_v10 = vpop.xlane.xlu0 %54 }
  0x8e   :  { %v57_v11 = vmul.f32 0.03125, %v55_v10 }
  0x90   :  { %v123_v12 = vpop.eup %122  ;;  %v59_v13 = vadd.f32 1e-06, %v57_v11 }
  0x91   :  { %v61_v14 = vmul.f32 %v123_v12, %v58_v9  ;;  %vm67_vm1 = vweird.f32 %v123_v12 }
  0x92   :  { %124 = vrsqrt.f32 %v59_v13  ;;  %vm68_vm3 = vmor %vm66_vm2, %vm67_vm1  ;;  %vm76_vm6 = vweird.f32 %v59_v13 }
  0x93   :  { %v62_v15 = vmul.f32 %v123_v12, %v61_v14 }
  0x95   :  { %v63_v16 = vmul.f32 0.5, %v62_v15 }
  0x97   :  { %v64_v17 = vsub.f32 1.5, %v63_v16 }
  0x98   :  { %v125_v18 = vpop.eup %124 }
  0x99   :  { %v65_v19 = vmul.f32 %v123_v12, %v64_v17  ;;  %v71_v20 = vmul.f32 %v125_v18, %v59_v13  ;;  %vm77_vm4 = vweird.f32 %v125_v18 }
  0x9a   :  { %vm78_vm7 = vmor %vm76_vm6, %vm77_vm4 }
  0x9b   :  { %v69_v22 = vsel %vm68_vm3, %v123_v12, %v65_v19  ;;  %v72_v23 = vmul.f32 %v125_v18, %v71_v20 }
  0x9c   :  { %v80_v24 = vmul.f32 %v114_v1, %v69_v22 }
  0x9d   :  { %v73_v25 = vmul.f32 0.5, %v72_v23 }
  0x9e   :  { %v85_v26 = vmul.f32 %v121_v21, %v80_v24 }
  0x9f   :  { %v74_v27 = vsub.f32 1.5, %v73_v25 }
  0xa0   :  { %v87_v28 = vpack.c.bf16 %v85_v26, %v85_v26 }
  0xa1   :  { %v75_v29 = vmul.f32 %v125_v18, %v74_v27 }
  0xa2   :  { %90 = vst.msk [vmem:[#allocation7] sm:$0xf] %vm89_vm5, %v87_v28 }
  0xa3   :  { %v79_v30 = vsel %vm78_vm7, %v125_v18, %v75_v29 }
  0xa4   :  { %v81_v31 = vmul.f32 %v115_v3, %v79_v30 }
  0xa6   :  { %v86_v32 = vmul.f32 %v121_v21, %v81_v31 }
  0xa8   :  { %v88_v33 = vpack.c.bf16 %v86_v32, %v86_v32 }
  0xaa   :  { %91 = vst.msk [vmem:[#allocation7 + $0x4] sm:$0xf] %vm89_vm5, %v88_v33 }
  0xab   :  { %104 = dma.vmem_to_hbm [thread:$0]  %s97_s1, 128, %s99_s23, [#allocation4], %s205_s17, %s205_s17, %s206_s18  }
  0xac   :  { %202 = dma.done.wait [#allocation4], 128  }
  0xad   :  { %203 = vsyncadd [#allocation4], 4294967168 }
  0xae   :  { %109 = vsyncpa [#allocation3], 1 }
  0xaf   :  { %110 = vsyncpa [#allocation6], 1 }
  0xb0   :  { %111 = vsyncpa [#allocation4], 1 }

</bundles_post_ra>
